<compile_context>
chip_gen: v5e
topology: v5e:2x2
jax: 0.10.0
libtpu: 0.0.40
codegen_flags: <defaults>
</compile_context>

<pallas_src>
import functools

import jax
import jax.numpy as jnp
from jax.experimental import pallas as pl
from jax.experimental.pallas import tpu as pltpu


# ----------------------------------------------------------------------------
# Generic tiled  act(A @ B + bias)  kernel with f32 accumulation
# ----------------------------------------------------------------------------
def _matmul_bias_act_kernel(a_ref, b_ref, bias_ref, o_ref, acc_ref, *, apply_act):
    k = pl.program_id(2)

    @pl.when(k == 0)
    def _init():
        acc_ref[...] = jnp.zeros_like(acc_ref)

    acc_ref[...] += jnp.dot(
        a_ref[...], b_ref[...], preferred_element_type=jnp.float32
    )

    @pl.when(k == pl.num_programs(2) - 1)
    def _finalize():
        res = acc_ref[...] + bias_ref[...].astype(jnp.float32)
        if apply_act:
            res = jnp.maximum(res, 0.0)  # ReLU activation
        o_ref[...] = res.astype(o_ref.dtype)


def _round_up(x, m):
    return ((x + m - 1) // m) * m


def _pick_tile(dim, target):
    """Largest multiple of 128 <= target that divides `dim` (dim % 128 == 0)."""
    t = min(target, dim)
    while dim % t:
        t -= 128
    return t


def tiled_matmul(a, b, bias_row, *, apply_act, out_dtype,
                 tm_target=256, tn_target=256, tk_target=512):
    """C = act(A @ B + bias).  All operand dims must be multiples of 128."""
    m, k = a.shape
    k2, n = b.shape
    assert k == k2 and bias_row.shape == (1, n)
    tm = _pick_tile(m, tm_target)
    tn = _pick_tile(n, tn_target)
    tk = _pick_tile(k, tk_target)
    grid = (m // tm, n // tn, k // tk)

    kernel = functools.partial(_matmul_bias_act_kernel, apply_act=apply_act)
    return pl.pallas_call(
        kernel,
        out_shape=jax.ShapeDtypeStruct((m, n), out_dtype),
        grid_spec=pltpu.PrefetchScalarGridSpec(
            num_scalar_prefetch=0,
            grid=grid,
            in_specs=[
                pl.BlockSpec((tm, tk), lambda i, j, kk: (i, kk)),
                pl.BlockSpec((tk, tn), lambda i, j, kk: (kk, j)),
                pl.BlockSpec((1, tn), lambda i, j, kk: (0, j)),
            ],
            out_specs=pl.BlockSpec((tm, tn), lambda i, j, kk: (i, j)),
            scratch_shapes=[pltpu.VMEM((tm, tn), jnp.float32)],
        ),
        compiler_params=pltpu.CompilerParams(
            dimension_semantics=("parallel", "parallel", "arbitrary"),
            vmem_limit_bytes=48 * 1024 * 1024,
        ),
    )(a, b, bias_row)


# ----------------------------------------------------------------------------
# One GraphConv layer:  act(A_hat @ H @ W + b), matmul order picked by FLOPs
# ----------------------------------------------------------------------------
def gcn_layer(adj_p, h_p, w_p, b_row, *, f_in, f_out, apply_act, out_dtype):
    if f_in < f_out:
        # Aggregate on the narrower (input) feature width: (A_hat @ H) @ W.
        zb = jnp.zeros((1, h_p.shape[1]), jnp.float32)
        ah = tiled_matmul(adj_p, h_p, zb, apply_act=False, out_dtype=jnp.bfloat16)
        return tiled_matmul(ah, w_p, b_row, apply_act=apply_act, out_dtype=out_dtype)
    # Transform first (output width <= input width): A_hat @ (H @ W).
    zb = jnp.zeros((1, w_p.shape[1]), jnp.float32)
    xw = tiled_matmul(h_p, w_p, zb, apply_act=False, out_dtype=jnp.bfloat16)
    return tiled_matmul(adj_p, xw, b_row, apply_act=apply_act, out_dtype=out_dtype)


# ----------------------------------------------------------------------------
# Model setup (glue: deterministic parameter init, adjacency normalization)
# ----------------------------------------------------------------------------
def xavier_uniform(key, fan_in, fan_out, dtype=jnp.float32):
    bound = (6.0 / (fan_in + fan_out)) ** 0.5
    return jax.random.uniform(key, (fan_in, fan_out), dtype, -bound, bound)


def init_gcn_params(key, in_feats, n_hidden, n_classes, n_layers):
    assert n_layers > 1
    dims = [in_feats] + [n_hidden] * (n_layers - 1) + [n_classes]
    params = []
    for l in range(n_layers):
        key, wk = jax.random.split(key)
        w = xavier_uniform(wk, dims[l], dims[l + 1])
        b = jnp.zeros((dims[l + 1],), jnp.float32)
        params.append((w, b))
    return params


def make_block_adj(key, n_dst, n_src, p=0.3):
    """Random bipartite block -> dense normalized A_hat = D_dst^-1/2 A D_src^-1/2.

    Matches DGL GraphConv(norm='both'): zero degrees map to norm 0 (not 1)."""
    a = (jax.random.uniform(key, (n_dst, n_src)) < p).astype(jnp.float32)
    deg_dst = a.sum(axis=1)
    deg_src = a.sum(axis=0)
    norm_dst = jnp.where(deg_dst > 0, jnp.where(deg_dst > 0, deg_dst, 1.0) ** -0.5, 0.0)
    norm_src = jnp.where(deg_src > 0, jnp.where(deg_src > 0, deg_src, 1.0) ** -0.5, 0.0)
    return norm_dst[:, None] * a * norm_src[None, :]


def _pad2d(x, row_mult=128, col_mult=128, dtype=None):
    r, c = x.shape
    rp, cp = _round_up(r, row_mult), _round_up(c, col_mult)
    out = jnp.pad(x, ((0, rp - r), (0, cp - c)))
    return out.astype(dtype) if dtype is not None else out


def gcn_forward(blocks, x, params):
    """Mirrors GCN.forward for the `blocks[0].is_block` (MFG / inference) path."""
    n_layers = len(params)
    n_dst_final = blocks[-1].shape[0]
    n_classes = params[-1][0].shape[1]

    h = _pad2d(x, dtype=jnp.bfloat16)
    for l, (adj, (w, b)) in enumerate(zip(blocks, params)):
        f_in, f_out = w.shape
        assert adj.shape[1] == (x.shape[0] if l == 0 else blocks[l - 1].shape[0])
        adj_p = _pad2d(adj, dtype=jnp.bfloat16)
        w_p = _pad2d(w, dtype=jnp.bfloat16)
        b_row = jnp.pad(b, (0, w_p.shape[1] - f_out)).reshape(1, -1).astype(jnp.float32)
        last = l == n_layers - 1
        h = gcn_layer(
            adj_p, h, w_p, b_row,
            f_in=f_in, f_out=f_out,
            apply_act=not last,
            out_dtype=jnp.float32 if last else jnp.bfloat16,
        )
        # dropout after every layer but the last: identity in eval mode
    return h[:n_dst_final, :n_classes]


if __name__ == "__main__":
    key = jax.random.PRNGKey(0)

    in_feats, n_hidden, n_classes, n_layers = 16, 32, 8, 3
    # src/dst node counts per sampled block (src >= dst, like DGL MFGs)
    block_sizes = [(64, 32), (32, 16), (16, 8)]

    key, kp, kx = jax.random.split(key, 3)
    params = init_gcn_params(kp, in_feats, n_hidden, n_classes, n_layers)

    blocks = []
    for (n_src, n_dst) in block_sizes:
        key, ka = jax.random.split(key)
        blocks.append(make_block_adj(ka, n_dst, n_src))

    x = jax.random.normal(kx, (block_sizes[0][0], in_feats), jnp.float32)

    out = gcn_forward(blocks, x, params)
    out = jax.block_until_ready(out)
    assert out.shape == (block_sizes[-1][1], n_classes)
    assert bool(jnp.all(jnp.isfinite(out)))
    print("KERNEL_OK")
</pallas_src>

<mosaic_0001>
module attributes {stable_mosaic.version = 11 : i64} {
  func.func @_matmul_bias_act_kernel(%arg0: i32, %arg1: i32, %arg2: i32, %arg3: memref<128x128xbf16, #tpu.memory_space<vmem>>, %arg4: memref<128x128xbf16, #tpu.memory_space<vmem>>, %arg5: memref<1x128xf32, #tpu.memory_space<vmem>>, %arg6: memref<128x128xbf16, #tpu.memory_space<vmem>>, %arg7: memref<128x128xf32, #tpu.memory_space<vmem>>) attributes {dimension_semantics = [#tpu.dimension_semantics<parallel>, #tpu.dimension_semantics<parallel>, #tpu.dimension_semantics<arbitrary>], iteration_bounds = array<i64: 1, 1, 1>, scalar_prefetch = 0 : i64, scratch_operands = 1 : i64, tpu.core_type = #tpu.core_type<tc>, window_params = [{transform_indices = @transform_0, window_bounds = array<i64: 128, 128>}, {transform_indices = @transform_1, window_bounds = array<i64: 128, 128>}, {transform_indices = @transform_2, window_bounds = array<i64: 1, 128>}, {transform_indices = @transform_3, window_bounds = array<i64: 128, 128>}]} {
    %c0_i32 = arith.constant 0 : i32
    %0 = arith.cmpi eq, %arg2, %c0_i32 : i32
    %1 = arith.extui %0 : i1 to i32
    %c0_i32_0 = arith.constant 0 : i32
    %2 = arith.cmpi ne, %1, %c0_i32_0 : i32
    scf.if %2 {
      %cst_10 = arith.constant 0.000000e+00 : f32
      %12 = vector.broadcast %cst_10 : f32 to vector<128x128xf32>
      %c0_11 = arith.constant 0 : index
      %c0_12 = arith.constant 0 : index
      %13 = vector.load %arg7[%c0_11, %c0_12] : memref<128x128xf32, #tpu.memory_space<vmem>>, vector<128x128xf32>
      tpu.vector_store %arg7[%c0_11, %c0_12], %12 {strides = array<i32>} : memref<128x128xf32, #tpu.memory_space<vmem>>, vector<128x128xf32>,
    } else {
    }
    %c0 = arith.constant 0 : index
    %c0_1 = arith.constant 0 : index
    %3 = vector.load %arg7[%c0, %c0_1] : memref<128x128xf32, #tpu.memory_space<vmem>>, vector<128x128xf32>
    %c0_2 = arith.constant 0 : index
    %c0_3 = arith.constant 0 : index
    %4 = vector.load %arg3[%c0_2, %c0_3] : memref<128x128xbf16, #tpu.memory_space<vmem>>, vector<128x128xbf16>
    %c0_4 = arith.constant 0 : index
    %c0_5 = arith.constant 0 : index
    %5 = vector.load %arg4[%c0_4, %c0_5] : memref<128x128xbf16, #tpu.memory_space<vmem>>, vector<128x128xbf16>
    %cst = arith.constant dense<0.000000e+00> : vector<128x128xf32>
    %6 = tpu.matmul %4, %5, %cst {dimension_numbers = #tpu.dot_dimension_numbers<[1], [0], [0], [1], [0, 0, 1, 1], [], []>} : vector<128x128xbf16>, vector<128x128xbf16>, vector<128x128xf32> -> vector<128x128xf32>
    %7 = arith.addf %3, %6 : vector<128x128xf32>
    %c0_6 = arith.constant 0 : index
    %c0_7 = arith.constant 0 : index
    %8 = vector.load %arg7[%c0_6, %c0_7] : memref<128x128xf32, #tpu.memory_space<vmem>>, vector<128x128xf32>
    tpu.vector_store %arg7[%c0_6, %c0_7], %7 {strides = array<i32>} : memref<128x128xf32, #tpu.memory_space<vmem>>, vector<128x128xf32>,
    %c0_i32_8 = arith.constant 0 : i32
    %9 = arith.cmpi eq, %arg2, %c0_i32_8 : i32
    %10 = arith.extui %9 : i1 to i32
    %c0_i32_9 = arith.constant 0 : i32
    %11 = arith.cmpi ne, %10, %c0_i32_9 : i32
    scf.if %11 {
      %c0_10 = arith.constant 0 : index
      %c0_11 = arith.constant 0 : index
      %12 = vector.load %arg7[%c0_10, %c0_11] : memref<128x128xf32, #tpu.memory_space<vmem>>, vector<128x128xf32>
      %c0_12 = arith.constant 0 : index
      %c0_13 = arith.constant 0 : index
      %13 = vector.load %arg5[%c0_12, %c0_13] : memref<1x128xf32, #tpu.memory_space<vmem>>, vector<1x128xf32>
      %14 = vector.broadcast %13 : vector<1x128xf32> to vector<128x128xf32>
      %15 = arith.addf %12, %14 : vector<128x128xf32>
      %16 = arith.truncf %15 : vector<128x128xf32> to vector<128x128xbf16>
      %c0_14 = arith.constant 0 : index
      %c0_15 = arith.constant 0 : index
      %17 = vector.load %arg6[%c0_14, %c0_15] : memref<128x128xbf16, #tpu.memory_space<vmem>>, vector<128x128xbf16>
      tpu.vector_store %arg6[%c0_14, %c0_15], %16 {strides = array<i32>} : memref<128x128xbf16, #tpu.memory_space<vmem>>, vector<128x128xbf16>,
    } else {
    }
    return
  }
  func.func @transform_0(%arg0: i32, %arg1: i32, %arg2: i32) -> (i32, i32) {
    %c0_i32 = arith.constant 0 : i32
    return %arg0, %arg2 : i32, i32
  }
  func.func @transform_1(%arg0: i32, %arg1: i32, %arg2: i32) -> (i32, i32) {
    %c0_i32 = arith.constant 0 : i32
    return %arg2, %arg1 : i32, i32
  }
  func.func @transform_2(%arg0: i32, %arg1: i32, %arg2: i32) -> (i32, i32) {
    %c0_i32 = arith.constant 0 : i32
    %c0_i32_0 = arith.constant 0 : i32
    return %c0_i32, %arg1 : i32, i32
  }
  func.func @transform_3(%arg0: i32, %arg1: i32, %arg2: i32) -> (i32, i32) {
    %c0_i32 = arith.constant 0 : i32
    return %arg0, %arg1 : i32, i32
  }
}

</mosaic_0001>

<bundles_post_ra>
// kernel: tpu_custom_call.1
= control target key start
LH: loop header
LB: loop body
LE: loop exit
PB: predicated region body
PF: predicated region fallthrough
CT: control target
= control target key end

     0   :  { %8 = vsyncpa [#allocation4], 0  ;;  %s664_s0 = inlined_call_operand.hbm [shape: bf16[128,128], index: 0, kind: input, shape index: {}]   ;;  %s665_s1 = inlined_call_operand.hbm [shape: bf16[128,128], index: 1, kind: input, shape index: {}]   ;;  %s666_s2 = inlined_call_operand.vmem [shape: f32[1,128], index: 2, kind: input, shape index: {}]   ;;  %s667_s3 = inlined_call_operand.hbm [shape: bf16[128,128], index: 3, kind: output, shape index: {}]  }
   0x1   :  { %9 = vsyncpa [#allocation7], 0 }
   0x2   :  { %10 = vsyncpa [#allocation5], 0  ;;  %s15_s14 = sshll.u32 %s664_s0, 4  ;;  %s618_s15 = smov [#allocation3]   ;;  %s16_s14 = int_to_ptr.hbm [resolvable:$true] %s15_s14 }
   0x3   :  { %s17_s16 = sshll.u32 %s618_s15, 4  ;;  %s28_s19 = sshll.u32 %s665_s1, 4  ;;  %s18_s16 = int_to_ptr.vmem [resolvable:$true] %s17_s16  ;;  %s29_s19 = int_to_ptr.hbm [resolvable:$true] %s28_s19 }
   0x4   :  { %s619_s20 = smov 64   ;;  %s620_s21 = smov 4  }
   0x5   :  { %23 = dma.hbm_to_vmem [thread:$0]  %s16_s14, 1024, %s18_s16, [#allocation4], %s619_s20, %s619_s20, %s620_s21  }
   0x6   :  { %s621_s22 = smov [#allocation6]  }
   0x7   :  { %s30_s23 = sshll.u32 %s621_s22, 4  ;;  %s31_s23 = int_to_ptr.vmem [resolvable:$true] %s30_s23 }
   0x8   :  { %36 = dma.hbm_to_vmem [thread:$0]  %s29_s19, 1024, %s31_s23, [#allocation7], %s619_s20, %s619_s20, %s620_s21  }
   0x9   :  { %612 = dma.done.wait [#allocation4], 1024  }
   0xa   :  { %613 = vsyncadd [#allocation4], 4294966272 }
   0xb   :  { %614 = dma.done.wait [#allocation7], 1024  }
   0xc   :  { %615 = vsyncadd [#allocation7], 4294966272  ;;  %v462_v0 = vld [vmem:[#allocation6 + $0x38] sm:$0xff]  ;;  %v461_v1 = vld [vmem:[#allocation6 + $0x30] sm:$0xff]  ;;  %s369_s27 = sshll.u32 %s667_s3, 4  ;;  %s370_s27 = int_to_ptr.hbm [resolvable:$true] %s369_s27 }
   0xd   :  { %211 = vmatpush.bf16.msra.mxu0 %v462_v0  ;;  %510 = vmatpush.bf16.msra.mxu1 %v462_v0  ;;  %v460_v2 = vld [vmem:[#allocation6 + $0x28] sm:$0xff]  ;;  %v459_v3 = vld [vmem:[#allocation6 + $0x20] sm:$0xff]  ;;  %v458_v4 = vld [vmem:[#allocation6 + $0x18] sm:$0xff] }
   0xe   :  { %511 = vmatpush.bf16.msra.mxu2 %v462_v0  ;;  %512 = vmatpush.bf16.msra.mxu3 %v462_v0  ;;  %v457_v5 = vld [vmem:[#allocation6 + $0x10] sm:$0xff]  ;;  %v456_v6 = vld [vmem:[#allocation6 + $0x8] sm:$0xff]  ;;  %v455_v7 = vld [vmem:[#allocation6] sm:$0xff] }
   0xf   :  { %v447_v8 = vld [vmem:[#allocation3] sm:$0xff]  ;;  %v449_v9 = vld [vmem:[#allocation3 + $0x10] sm:$0xff]  ;;  %v448_v12 = vld [vmem:[#allocation3 + $0x8] sm:$0xff] }
  0x10   :  { %v451_v10 = vld [vmem:[#allocation3 + $0x20] sm:$0xff]  ;;  %v453_v11 = vld [vmem:[#allocation3 + $0x30] sm:$0xff]  ;;  %v450_v13 = vld [vmem:[#allocation3 + $0x18] sm:$0xff] }
  0x11   :  { %212 = vmatpush.bf16.msra.mxu0 %v461_v1  ;;  %513 = vmatpush.bf16.msra.mxu1 %v461_v1  ;;  %v452_v14 = vld [vmem:[#allocation3 + $0x28] sm:$0xff]  ;;  %v454_v15 = vld [vmem:[#allocation3 + $0x38] sm:$0xff]  ;;  %v539_v18 = vld [vmem:[%s666_s2] ss:$0 sm:$0xff]  ;;  %s622_s2 = smov [#allocation8]  }
  0x12   :  { %514 = vmatpush.bf16.msra.mxu2 %v461_v1  ;;  %515 = vmatpush.bf16.msra.mxu3 %v461_v1  ;;  %s367_s24 = sshll.u32 %s622_s2, 4  ;;  %s368_s24 = int_to_ptr.vmem [resolvable:$true] %s367_s24 }
  0x15   :  { %213 = vmatpush.bf16.msra.mxu0 %v460_v2  ;;  %516 = vmatpush.bf16.msra.mxu1 %v460_v2 }
  0x16   :  { %517 = vmatpush.bf16.msra.mxu2 %v460_v2  ;;  %518 = vmatpush.bf16.msra.mxu3 %v460_v2 }
  0x19   :  { %214 = vmatpush.bf16.msra.mxu0 %v459_v3  ;;  %519 = vmatpush.bf16.msra.mxu1 %v459_v3 }
  0x1a   :  { %520 = vmatpush.bf16.msra.mxu2 %v459_v3  ;;  %521 = vmatpush.bf16.msra.mxu3 %v459_v3 }
  0x1d   :  { %215 = vmatpush.bf16.msra.mxu0 %v458_v4  ;;  %522 = vmatpush.bf16.msra.mxu1 %v458_v4 }
  0x1e   :  { %523 = vmatpush.bf16.msra.mxu2 %v458_v4  ;;  %524 = vmatpush.bf16.msra.mxu3 %v458_v4 }
  0x21   :  { %216 = vmatpush.bf16.msra.mxu0 %v457_v5  ;;  %525 = vmatpush.bf16.msra.mxu1 %v457_v5 }
  0x22   :  { %526 = vmatpush.bf16.msra.mxu2 %v457_v5  ;;  %527 = vmatpush.bf16.msra.mxu3 %v457_v5 }
  0x25   :  { %217 = vmatpush.bf16.msra.mxu0 %v456_v6  ;;  %528 = vmatpush.bf16.msra.mxu1 %v456_v6 }
  0x26   :  { %529 = vmatpush.bf16.msra.mxu2 %v456_v6  ;;  %530 = vmatpush.bf16.msra.mxu3 %v456_v6 }
  0x29   :  { %218 = vmatpush.bf16.msra.mxu0 %v455_v7  ;;  %531 = vmatpush.bf16.msra.mxu1 %v455_v7 }
  0x2a   :  { %532 = vmatpush.bf16.msra.mxu2 %v455_v7  ;;  %533 = vmatpush.bf16.msra.mxu3 %v455_v7 }
  0x2c   :  { %219 = vmatmul.bf16.vlgmr.msra.gmra.mxu0 %v447_v8  ;;  %229 = vmatmul.bf16.vlgmr.msra.gmra.mxu1 %v449_v9 }
  0x2d   :  { %239 = vmatmul.bf16.vlgmr.msra.gmra.mxu2 %v451_v10  ;;  %249 = vmatmul.bf16.vlgmr.msra.gmra.mxu3 %v453_v11 }
  0x3c   :  { %224 = vmatmul.bf16.gmra.mxu0 %v448_v12  ;;  %234 = vmatmul.bf16.gmra.mxu1 %v450_v13 }
  0x3d   :  { %244 = vmatmul.bf16.gmra.mxu2 %v452_v14  ;;  %254 = vmatmul.bf16.gmra.mxu3 %v454_v15 }
  0xa9   :  { %v220_v16 = vpop.f32.mrf.mxu0  ;;  %v230_v17 = vpop.f32.mrf.mxu1 }
  0xaa   :  { %v315_v23 = vadd.f32 %v539_v18, %v220_v16  ;;  %v319_v24 = vadd.f32 %v539_v18, %v230_v17 }
  0xb0   :  { %v240_v19 = vpop.f32.mrf.mxu2  ;;  %v250_v20 = vpop.f32.mrf.mxu3 }
  0xb1   :  { %v222_v21 = vpop.f32.mrf.mxu0  ;;  %v232_v22 = vpop.f32.mrf.mxu1  ;;  %v323_v31 = vadd.f32 %v539_v18, %v240_v19  ;;  %v327_v32 = vadd.f32 %v539_v18, %v250_v20 }
  0xb2   :  { %v316_v25 = vadd.f32 %v539_v18, %v222_v21  ;;  %v320_v26 = vadd.f32 %v539_v18, %v232_v22 }
  0xb4   :  { %v466_v27 = vpack.c.bf16 %v316_v25, %v315_v23  ;;  %v476_v28 = vpack.c.bf16 %v320_v26, %v319_v24 }
  0xb6   :  { %467 = vst [vmem:[#allocation8] sm:$0xff] %v466_v27  }
  0xb7   :  { %504 = vst [vmem:[#allocation8 + $0x10] sm:$0xff] %v476_v28  }
  0xb8   :  { %v242_v29 = vpop.f32.mrf.mxu2  ;;  %v252_v30 = vpop.f32.mrf.mxu3 }
  0xb9   :  { %v324_v33 = vadd.f32 %v539_v18, %v242_v29  ;;  %v328_v34 = vadd.f32 %v539_v18, %v252_v30  ;;  %v225_v35 = vpop.f32.mrf.mxu0  ;;  %v235_v36 = vpop.f32.mrf.mxu1 }
  0xba   :  { %v317_v43 = vadd.f32 %v539_v18, %v225_v35  ;;  %v321_v44 = vadd.f32 %v539_v18, %v235_v36 }
  0xbb   :  { %v486_v37 = vpack.c.bf16 %v324_v33, %v323_v31  ;;  %v496_v38 = vpack.c.bf16 %v328_v34, %v327_v32 }
  0xbd   :  { %506 = vst [vmem:[#allocation8 + $0x20] sm:$0xff] %v486_v37  }
  0xbe   :  { %508 = vst [vmem:[#allocation8 + $0x30] sm:$0xff] %v496_v38  }
  0xc0   :  { %v245_v39 = vpop.f32.mrf.mxu2  ;;  %v255_v40 = vpop.f32.mrf.mxu3 }
  0xc1   :  { %v227_v41 = vpop.f32.mrf.mxu0  ;;  %v237_v42 = vpop.f32.mrf.mxu1  ;;  %v325_v51 = vadd.f32 %v539_v18, %v245_v39  ;;  %v329_v52 = vadd.f32 %v539_v18, %v255_v40 }
  0xc2   :  { %v318_v45 = vadd.f32 %v539_v18, %v227_v41  ;;  %v322_v46 = vadd.f32 %v539_v18, %v237_v42 }
  0xc4   :  { %v471_v47 = vpack.c.bf16 %v318_v45, %v317_v43  ;;  %v481_v48 = vpack.c.bf16 %v322_v46, %v321_v44 }
  0xc6   :  { %503 = vst [vmem:[#allocation8 + $0x8] sm:$0xff] %v471_v47  }
  0xc7   :  { %505 = vst [vmem:[#allocation8 + $0x18] sm:$0xff] %v481_v48  }
  0xc8   :  { %v247_v49 = vpop.f32.mrf.mxu2  ;;  %v257_v50 = vpop.f32.mrf.mxu3 }
  0xc9   :  { %v326_v53 = vadd.f32 %v539_v18, %v247_v49  ;;  %v330_v54 = vadd.f32 %v539_v18, %v257_v50 }
  0xcb   :  { %v491_v55 = vpack.c.bf16 %v326_v53, %v325_v51  ;;  %v501_v56 = vpack.c.bf16 %v330_v54, %v329_v52 }
  0xcd   :  { %507 = vst [vmem:[#allocation8 + $0x28] sm:$0xff] %v491_v55  }
  0xce   :  { %509 = vst [vmem:[#allocation8 + $0x38] sm:$0xff] %v501_v56  }
  0xcf   :  { %375 = dma.vmem_to_hbm [thread:$0]  %s368_s24, 1024, %s370_s27, [#allocation5], %s619_s20, %s619_s20, %s620_s21  }
  0xd0   :  { %616 = dma.done.wait [#allocation5], 1024  }
  0xd1   :  { %617 = vsyncadd [#allocation5], 4294966272 }
  0xd2   :  { %380 = vsyncpa [#allocation4], 1 }
  0xd3   :  { %381 = vsyncpa [#allocation7], 1 }
  0xd4   :  { %382 = vsyncpa [#allocation5], 1 }

</bundles_post_ra>
